<compile_context>
chip_gen: v6e
topology: v6e:2x2x1
jax: 0.10.0
libtpu: 0.0.40
codegen_flags: <defaults>
</compile_context>

<pallas_src>
import jax
import jax.numpy as jnp
from jax import lax
from jax.experimental import pallas as pl
from jax.experimental.pallas import tpu as pltpu

NUM_MASK_COLS = 1000      # learned attention mask width (only cols that can be nonzero)
NC_PAD = 1024             # 1000 padded up to 8*128 for lane-aligned blocks
NUM_FEATURES = 16080      # flattened feature length (80 * 201)
TOPK_K = 200


def _round_up(v, m):
    return ((v + m - 1) // m) * m


def _sparse_mask_mul_kernel(x_ref, att_ref, out_ref):
    # x_ref  : (tb, NC_PAD)     active columns of x for this batch tile
    # att_ref: (T,  NC_PAD)     active columns of the scattered attention (resident)
    # out_ref: (tb*T, N)        rows collapsed as b*T + t  ->  final (B, T, N) layout
    tb = x_ref.shape[0]
    T = att_ref.shape[0]
    rows, N = out_ref.shape
    att = att_ref[...]                                          # (T, NC_PAD)

    # ~94% of the output bytes are structurally zero: one dense, unmasked store.
    out_ref[:, NC_PAD:] = jnp.zeros((rows, N - NC_PAD), out_ref.dtype)

    # Active columns: for batch row i, output rows [i*T, (i+1)*T) = x[i] * att.
    def body(i, carry):
        x_row = x_ref[pl.ds(i, 1), :]                           # (1, NC_PAD)
        out_ref[pl.ds(i * T, T), :NC_PAD] = x_row * att         # (T, NC_PAD)
        return carry

    lax.fori_loop(0, tb, body, 0, unroll=min(tb, 8))


def _pick_batch_tile(B, T, N):
    """Choose tb (batch rows per grid step) for the collapsed (tb*T, N) output block.

    Targets multi-MB per-step slabs, keeps the double-buffered output block under a
    ~24 MiB budget (safe on v5e/v6e/v7x once vmem_limit_bytes is raised), keeps block
    sublane dims a multiple of 8 (or equal to the full dim), and prefers an even
    number of grid steps so v7x's two TensorCores can split the grid.
    """
    row_bytes = N * 4                                   # one f32 output row
    out_budget = 24 << 20                               # double-buffered output block
    max_rows = max(8, out_budget // (2 * row_bytes))    # cap on tb*T per buffer
    tb_cap = max(1, max_rows // T)

    if B <= tb_cap:
        # Whole batch fits one block.  Split in two (even grid) only if each half
        # still writes a multi-MB slab -- lets v7x shard the grid across 2 cores.
        half8 = _round_up((B + 1) // 2, 8)
        if half8 < B and half8 * T * row_bytes >= (4 << 20):
            return half8
        return B

    # Many grid steps: largest multiple-of-8 tile under the VMEM cap.
    tb = max(8, (tb_cap // 8) * 8)
    steps = -(-B // tb)
    if steps > 1 and steps % 2 == 1:
        alt = _round_up(-(-B // (steps + 1)), 8)
        if alt >= 8 and alt * T * row_bytes >= (2 << 20):
            tb = alt
    return tb


def feature_selection_forward(x, attention_mask, number_of_trees, batch_size):
    B = x.shape[0]
    T = number_of_trees
    N = NUM_FEATURES

    assert x.shape[1] * x.shape[2] == N, "flattened feature length must be 16080"
    assert x.shape[0] == batch_size
    assert attention_mask.shape == (T, NUM_MASK_COLS)
    # The "columns >= 1000 are zero" shortcut relies on this.
    assert NUM_MASK_COLS <= NC_PAD

    # ---- glue: flatten exactly like x.view(-1, shape[1]*shape[2]) ----
    x_flat = x.reshape(B, N).astype(jnp.float32)

    # ---- glue: sigmoid -> top-k -> scatter (tiny, plain XLA) ----
    # TODO(synk): torch.topk / scatter_ have no Pallas primitive; done with
    # lax.top_k + .at[].set (tie-breaking at the k-th value may differ from torch).
    attention_tmp = jax.nn.sigmoid(attention_mask.astype(jnp.float32))
    topk_vals, topk_idx = jax.lax.top_k(attention_tmp, TOPK_K)
    att_active = jnp.zeros((T, NUM_MASK_COLS), jnp.float32).at[
        jnp.arange(T)[:, None], topk_idx
    ].set(topk_vals)
    # Full (T, 16080) attention to return (columns >= 1000 zero by construction).
    attention = jnp.pad(att_active, ((0, 0), (0, N - NUM_MASK_COLS)))
    # Active-column operand for the kernel (1000 -> 1024 = 8*128, zero padded).
    att_act = jnp.pad(att_active, ((0, 0), (0, NC_PAD - NUM_MASK_COLS)))   # (T, 1024)

    tb = _pick_batch_tile(B, T, N)
    grid = (pl.cdiv(B, tb),)

    # VMEM accounting with sublane padding (second-to-last dim rounded to 8, f32).
    out_blk = _round_up(tb * T, 8) * N * 4
    x_blk = _round_up(tb, 8) * NC_PAD * 4
    att_blk = _round_up(T, 8) * NC_PAD * 4
    working = 2 * (out_blk + x_blk + att_blk)          # double-buffered working set
    vmem_limit = int(min(max(working + (4 << 20), 16 << 20), 40 << 20))

    # ---- hot path: sparse broadcast multiply + structural-zero memset ----
    out2d = pl.pallas_call(
        _sparse_mask_mul_kernel,
        out_shape=jax.ShapeDtypeStruct((B * T, N), jnp.float32),
        grid_spec=pltpu.PrefetchScalarGridSpec(
            num_scalar_prefetch=0,
            grid=grid,
            in_specs=[
                pl.BlockSpec((tb, NC_PAD), lambda b: (b, 0)),   # x_flat active cols
                pl.BlockSpec((T, NC_PAD), lambda b: (0, 0)),    # attention, resident
            ],
            out_specs=pl.BlockSpec((tb * T, N), lambda b: (b, 0)),
        ),
        compiler_params=pltpu.CompilerParams(
            dimension_semantics=("parallel",),
            vmem_limit_bytes=vmem_limit,
        ),
    )(x_flat, att_act)

    out = out2d.reshape(B, T, N)    # contiguous metadata reshape, no HBM round trip
    return out, attention


if __name__ == "__main__":
    number_of_trees = 4
    batch_size = 2

    key = jax.random.PRNGKey(0)
    k_mask, k_x = jax.random.split(key)

    # deterministic parameter init: uniform(-1, 1), shape (T, 1000)
    attention_mask = jax.random.uniform(
        k_mask, (number_of_trees, NUM_MASK_COLS),
        dtype=jnp.float32, minval=-1.0, maxval=1.0,
    )
    # input consistent with the forward: (B, 80, 201) -> flattened 16080 features
    x = jax.random.normal(k_x, (batch_size, 80, 201), dtype=jnp.float32)

    out, attention = feature_selection_forward(
        x, attention_mask, number_of_trees, batch_size
    )
    out = jax.block_until_ready(out)
    attention = jax.block_until_ready(attention)

    # sanity check against a plain-JAX reference of the same math
    x_flat = x.reshape(batch_size, -1)
    ref = x_flat[:, None, :] * attention[None, :, :]
    assert out.shape == (batch_size, number_of_trees, NUM_FEATURES)
    assert attention.shape == (number_of_trees, NUM_FEATURES)
    assert jnp.allclose(out, ref, atol=1e-6)

    print("KERNEL_OK")
</pallas_src>

<mosaic_0001>
module attributes {stable_mosaic.version = 11 : i64} {
  func.func @_sparse_mask_mul_kernel(%arg0: i32, %arg1: memref<2x1024xf32, #tpu.memory_space<vmem>>, %arg2: memref<4x1024xf32, #tpu.memory_space<vmem>>, %arg3: memref<8x16080xf32, #tpu.memory_space<vmem>>) attributes {dimension_semantics = [#tpu.dimension_semantics<parallel>], iteration_bounds = array<i64: 1>, scalar_prefetch = 0 : i64, scratch_operands = 0 : i64, tpu.core_type = #tpu.core_type<tc>, window_params = [{transform_indices = @transform_0, window_bounds = array<i64: 2, 1024>}, {pipeline_mode = #tpu.pipeline_mode<synchronous>, transform_indices = @transform_1, window_bounds = array<i64: 4, 1024>}, {transform_indices = @transform_2, window_bounds = array<i64: 8, 16080>}]} {
    %c0 = arith.constant 0 : index
    %c0_0 = arith.constant 0 : index
    %0 = vector.load %arg2[%c0, %c0_0] : memref<4x1024xf32, #tpu.memory_space<vmem>>, vector<4x1024xf32>
    %cst = arith.constant 0.000000e+00 : f32
    %1 = vector.broadcast %cst : f32 to vector<8x15056xf32>
    %c0_1 = arith.constant 0 : index
    %c1024 = arith.constant 1024 : index
    %2 = vector.load %arg3[%c0_1, %c1024] : memref<8x16080xf32, #tpu.memory_space<vmem>>, vector<8x15056xf32>
    tpu.vector_store %arg3[%c0_1, %c1024], %1 {strides = array<i32>} : memref<8x16080xf32, #tpu.memory_space<vmem>>, vector<8x15056xf32>,
    %c0_i32 = arith.constant 0 : i32
    %3 = arith.index_cast %c0_i32 : i32 to index
    %c0_2 = arith.constant 0 : index
    %4 = vector.load %arg1[%3, %c0_2] : memref<2x1024xf32, #tpu.memory_space<vmem>>, vector<1x1024xf32>
    %5 = vector.broadcast %4 : vector<1x1024xf32> to vector<4x1024xf32>
    %6 = arith.mulf %5, %0 : vector<4x1024xf32>
    %c4_i32 = arith.constant 4 : i32
    %7 = arith.muli %c0_i32, %c4_i32 : i32
    %8 = arith.index_cast %7 : i32 to index
    %c0_3 = arith.constant 0 : index
    %9 = vector.load %arg3[%8, %c0_3] : memref<8x16080xf32, #tpu.memory_space<vmem>>, vector<4x1024xf32>
    tpu.vector_store %arg3[%8, %c0_3], %6 {strides = array<i32>} : memref<8x16080xf32, #tpu.memory_space<vmem>>, vector<4x1024xf32>,
    %c1_i32 = arith.constant 1 : i32
    %10 = arith.index_cast %c1_i32 : i32 to index
    %c0_4 = arith.constant 0 : index
    %11 = vector.load %arg1[%10, %c0_4] : memref<2x1024xf32, #tpu.memory_space<vmem>>, vector<1x1024xf32>
    %12 = vector.broadcast %11 : vector<1x1024xf32> to vector<4x1024xf32>
    %13 = arith.mulf %12, %0 : vector<4x1024xf32>
    %c4_i32_5 = arith.constant 4 : i32
    %14 = arith.muli %c1_i32, %c4_i32_5 : i32
    %15 = arith.index_cast %14 : i32 to index
    %c0_6 = arith.constant 0 : index
    %16 = vector.load %arg3[%15, %c0_6] : memref<8x16080xf32, #tpu.memory_space<vmem>>, vector<4x1024xf32>
    tpu.vector_store %arg3[%15, %c0_6], %13 {strides = array<i32>} : memref<8x16080xf32, #tpu.memory_space<vmem>>, vector<4x1024xf32>,
    %c2_i32 = arith.constant 2 : i32
    return
  }
  func.func @transform_0(%arg0: i32) -> (i32, i32) {
    %c0_i32 = arith.constant 0 : i32
    %c0_i32_0 = arith.constant 0 : i32
    return %arg0, %c0_i32 : i32, i32
  }
  func.func @transform_1(%arg0: i32) -> (i32, i32) {
    %c0_i32 = arith.constant 0 : i32
    %c0_i32_0 = arith.constant 0 : i32
    %c0_i32_1 = arith.constant 0 : i32
    return %c0_i32, %c0_i32_0 : i32, i32
  }
  func.func @transform_2(%arg0: i32) -> (i32, i32) {
    %c0_i32 = arith.constant 0 : i32
    %c0_i32_0 = arith.constant 0 : i32
    return %arg0, %c0_i32 : i32, i32
  }
}

</mosaic_0001>

<bundles_post_ra>
// kernel: tpu_custom_call.1
= control target key start
LH: loop header
LB: loop body
LE: loop exit
PB: predicated region body
PF: predicated region fallthrough
CT: control target
= control target key end

     0   :  { %7 = vsyncpa [#allocation3], 0  ;;  %s550_s0 = inlined_call_operand.hbm [shape: f32[2,16080], index: 0, kind: input, shape index: {}]   ;;  %s551_s1 = inlined_call_operand.hbm [shape: f32[4,1024], index: 1, kind: input, shape index: {}]   ;;  %s552_s2 = inlined_call_operand.hbm [shape: f32[8,16080], index: 2, kind: output, shape index: {}]  }
   0x1   :  { %8 = vsyncpa [#allocation6], 0 }
   0x2   :  { %9 = vsyncpa [#allocation4], 0  ;;  %s402_s9 = smov [#allocation2]   ;;  %s403_s11 = smov [#allocation5]  }
   0x3   :  { %s16_s10 = sshll.u32 %s402_s9, 4  ;;  %s26_s12 = sshll.u32 %s403_s11, 4  ;;  %s17_s10 = int_to_ptr.vmem [resolvable:$true] %s16_s10  ;;  %s27_s12 = int_to_ptr.vmem [resolvable:$true] %s26_s12 }
   0x4   :  { %s344_s13 = scalar_lea.vmem %s17_s10, 256  ;;  %p349_p1 = scmp.lt.s32.totalorder %s17_s10, %s17_s10 }
   0x5   :  { %p345_p0 = scmp.ne.s32.totalorder %s17_s10, %s344_s13  ;;  %p350_p2 = scmp.lt.s32.totalorder %s344_s13, %s344_s13 }
   0x7   :  { %p351_p3 = por %p350_p2, %p349_p1 }
   0x9   :  { %p352_p4 = pnand %p351_p3, %p345_p0 }
   0xb   :  { %355 = shalt.err (!%p352_p4)
}
   0xc   :  { %19 = dma.hbm_to_vmem [thread:$0]  %s550_s0, 256, %s17_s10, [#allocation3]  }
   0xd   :  { %s364_s16 = scalar_lea.vmem %s27_s12, 512  ;;  %p369_p6 = scmp.lt.s32.totalorder %s27_s12, %s27_s12 }
   0xe   :  { %p365_p5 = scmp.ne.s32.totalorder %s27_s12, %s364_s16  ;;  %p370_p7 = scmp.lt.s32.totalorder %s364_s16, %s364_s16 }
  0x10   :  { %p371_p8 = por %p370_p7, %p369_p6 }
  0x12   :  { %p372_p9 = pnand %p371_p8, %p365_p5 }
  0x14   :  { %375 = shalt.err (!%p372_p9)
}
  0x15   :  { %29 = dma.hbm_to_vmem [thread:$0]  %s551_s1, 512, %s27_s12, [#allocation6]  }
  0x16   :  { %396 = dma.done.wait [#allocation3], 256  }
  0x17   :  { %397 = vsyncadd [#allocation3], 4294967040 }
  0x18   :  { %398 = dma.done.wait [#allocation6], 512  }
  0x19   :  { %399 = vsyncadd [#allocation6], 4294966784  ;;  %vm157_vm0 = vcmask 654336   ;;  %v161_v0 = vlaneseq  ;;  %v404_v1 = vmov 0.0   ;;  %v36_v9 = vld [vmem:[#allocation5] sm:$0xff]  ;;  %v37_v11 = vld [vmem:[#allocation5 + $0x8] sm:$0xff] }
  0x1a   :  { %40 = vst [vmem:[#allocation7 + $0x40] sm:$0xff] %v404_v1  ;;  %41 = vst [vmem:[#allocation7 + $0x48] sm:$0xff] %v404_v1  ;;  %v159_v10 = vld [vmem:[#allocation2] ss:$2 sm:$0xff]  ;;  %v205_v16 = vcombine.high %v36_v9, %v36_v9  ;;  %v206_v20 = vcombine.high %v37_v11, %v37_v11  ;;  %v230_v24 = vld [vmem:[#allocation2 + $0x1] ss:$2 sm:$0xff] }
  0x1b   :  { %42 = vst [vmem:[#allocation7 + $0x50] sm:$0xff] %v404_v1  ;;  %43 = vst [vmem:[#allocation7 + $0x58] sm:$0xff] %v404_v1  ;;  %v162_v2 = vshrl.u32 %v161_v0, 7  ;;  %v38_v18 = vld [vmem:[#allocation5 + $0x10] sm:$0xff]  ;;  %v39_v23 = vld [vmem:[#allocation5 + $0x18] sm:$0xff]  ;;  %s405_s0 = smov [#allocation7]  }
  0x1c   :  { %44 = vst [vmem:[#allocation7 + $0x60] sm:$0xff] %v404_v1  ;;  %45 = vst [vmem:[#allocation7 + $0x68] sm:$0xff] %v404_v1  ;;  %v207_v28 = vcombine.high %v38_v18, %v38_v18  ;;  %v208_v34 = vcombine.high %v39_v23, %v39_v23  ;;  %s318_s1 = sshll.u32 %s405_s0, 4  ;;  %s319_s1 = int_to_ptr.vmem [resolvable:$true] %s318_s1 }
  0x1d   :  { %46 = vst [vmem:[#allocation7 + $0x70] sm:$0xff] %v404_v1  ;;  %47 = vst [vmem:[#allocation7 + $0x78] sm:$0xff] %v404_v1  ;;  %v163_v3 = vsub.s32 0, %v162_v2  ;;  %v167_v4 = vsub.s32 1, %v162_v2  ;;  %v171_v5 = vsub.s32 2, %v162_v2  ;;  %v175_v6 = vsub.s32 3, %v162_v2  ;;  %p381_p11 = scmp.lt.s32.totalorder %s319_s1, %s319_s1 }
  0x1e   :  { %48 = vst [vmem:[#allocation7 + $0x80] sm:$0xff] %v404_v1  ;;  %49 = vst [vmem:[#allocation7 + $0x88] sm:$0xff] %v404_v1  ;;  %v179_v7 = vsub.s32 4, %v162_v2  ;;  %v183_v8 = vsub.s32 5, %v162_v2  ;;  %v187_v12 = vsub.s32 6, %v162_v2  ;;  %v191_v13 = vsub.s32 7, %v162_v2 }
  0x1f   :  { %50 = vst [vmem:[#allocation7 + $0x90] sm:$0xff] %v404_v1  ;;  %51 = vst [vmem:[#allocation7 + $0x98] sm:$0xff] %v404_v1  ;;  %v164_v14 = vrot.slane %v159_v10, %v163_v3  ;;  %v168_v15 = vrot.slane %v159_v10, %v167_v4  ;;  %v172_v17 = vrot.slane %v159_v10, %v171_v5  ;;  %s376_s19 = scalar_lea.vmem %s319_s1, 16128 }
  0x20   :  { %52 = vst [vmem:[#allocation7 + $0xa0] sm:$0xff] %v404_v1  ;;  %53 = vst [vmem:[#allocation7 + $0xa8] sm:$0xff] %v404_v1  ;;  %v176_v19 = vrot.slane %v159_v10, %v175_v6  ;;  %v180_v21 = vrot.slane %v159_v10, %v179_v7  ;;  %v184_v22 = vrot.slane %v159_v10, %v183_v8  ;;  %p377_p10 = scmp.ne.s32.totalorder %s319_s1, %s376_s19  ;;  %p382_p12 = scmp.lt.s32.totalorder %s376_s19, %s376_s19 }
  0x21   :  { %54 = vst [vmem:[#allocation7 + $0xb0] sm:$0xff] %v404_v1  ;;  %55 = vst [vmem:[#allocation7 + $0xb8] sm:$0xff] %v404_v1  ;;  %v213_v25 = vmul.f32 %v164_v14, %v36_v9  ;;  %v214_v26 = vmul.f32 %v205_v16, %v168_v15  ;;  %v215_v27 = vmul.f32 %v172_v17, %v37_v11 }
  0x22   :  { %56 = vst [vmem:[#allocation7 + $0xc0] sm:$0xff] %v404_v1  ;;  %57 = vst [vmem:[#allocation7 + $0xc8] sm:$0xff] %v404_v1  ;;  %v216_v29 = vmul.f32 %v206_v20, %v176_v19  ;;  %v217_v30 = vmul.f32 %v180_v21, %v38_v18  ;;  %v188_v31 = vrot.slane %v159_v10, %v187_v12  ;;  %p383_p13 = por %p382_p12, %p381_p11 }
  0x23   :  { %58 = vst [vmem:[#allocation7 + $0xd0] sm:$0xff] %v404_v1  ;;  %59 = vst [vmem:[#allocation7 + $0xd8] sm:$0xff] %v404_v1  ;;  %v192_v32 = vrot.slane %v159_v10, %v191_v13  ;;  %v218_v33 = vmul.f32 %v207_v28, %v184_v22  ;;  %v235_v35 = vrot.slane %v230_v24, %v163_v3 }
  0x24   :  { %60 = vst [vmem:[#allocation7 + $0xe0] sm:$0xff] %v404_v1  ;;  %61 = vst [vmem:[#allocation7 + $0xe8] sm:$0xff] %v404_v1  ;;  %v239_v36 = vrot.slane %v230_v24, %v167_v4  ;;  %v219_v37 = vmul.f32 %v188_v31, %v39_v23  ;;  %v243_v38 = vrot.slane %v230_v24, %v171_v5  ;;  %p384_p0 = pnand %p383_p13, %p377_p10 }
  0x25   :  { %62 = vst [vmem:[#allocation7 + $0xf0] sm:$0xff] %v404_v1  ;;  %63 = vst [vmem:[#allocation7 + $0xf8] sm:$0xff] %v404_v1  ;;  %v247_v39 = vrot.slane %v230_v24, %v175_v6  ;;  %v251_v40 = vrot.slane %v230_v24, %v179_v7  ;;  %v220_v41 = vmul.f32 %v208_v34, %v192_v32 }
  0x26   :  { %64 = vst [vmem:[#allocation7 + $0x100] sm:$0xff] %v404_v1  ;;  %65 = vst [vmem:[#allocation7 + $0x108] sm:$0xff] %v404_v1  ;;  %v272_v42 = vmul.f32 %v235_v35, %v36_v9  ;;  %v273_v43 = vmul.f32 %v239_v36, %v205_v16  ;;  %v255_v44 = vrot.slane %v230_v24, %v183_v8 }
  0x27   :  { %66 = vst [vmem:[#allocation7 + $0x110] sm:$0xff] %v404_v1  ;;  %67 = vst [vmem:[#allocation7 + $0x118] sm:$0xff] %v404_v1  ;;  %v274_v45 = vmul.f32 %v243_v38, %v37_v11  ;;  %v275_v46 = vmul.f32 %v247_v39, %v206_v20  ;;  %v276_v47 = vmul.f32 %v251_v40, %v38_v18 }
  0x28   :  { %68 = vst [vmem:[#allocation7 + $0x120] sm:$0xff] %v404_v1  ;;  %69 = vst [vmem:[#allocation7 + $0x128] sm:$0xff] %v404_v1  ;;  %v259_v48 = vrot.slane %v230_v24, %v187_v12  ;;  %v288_v49 = vrot.slane %v272_v42, 4  ;;  %v289_v50 = vrot.slane %v273_v43, 4  ;;  %v277_v51 = vmul.f32 %v255_v44, %v207_v28 }
  0x29   :  { %70 = vst [vmem:[#allocation7 + $0x130] sm:$0xff] %v404_v1  ;;  %71 = vst [vmem:[#allocation7 + $0x138] sm:$0xff] %v404_v1  ;;  %v263_v52 = vrot.slane %v230_v24, %v191_v13  ;;  %v290_v53 = vrot.slane %v274_v45, 4  ;;  %v291_v54 = vrot.slane %v275_v46, 4  ;;  %v292_v55 = vrot.slane %v276_v47, 4 }
  0x2a   :  { %72 = vst [vmem:[#allocation7 + $0x140] sm:$0xff] %v404_v1  ;;  %73 = vst [vmem:[#allocation7 + $0x148] sm:$0xff] %v404_v1  ;;  %v278_v56 = vmul.f32 %v259_v48, %v39_v23  ;;  %v293_v57 = vrot.slane %v277_v51, 4 }
  0x2b   :  { %74 = vst [vmem:[#allocation7 + $0x150] sm:$0xff] %v404_v1  ;;  %75 = vst [vmem:[#allocation7 + $0x158] sm:$0xff] %v404_v1  ;;  %v279_v58 = vmul.f32 %v263_v52, %v208_v34 }
  0x2c   :  { %76 = vst [vmem:[#allocation7 + $0x160] sm:$0xff] %v404_v1  ;;  %77 = vst [vmem:[#allocation7 + $0x168] sm:$0xff] %v404_v1  ;;  %v294_v59 = vrot.slane %v278_v56, 4 }
  0x2d   :  { %78 = vst [vmem:[#allocation7 + $0x170] sm:$0xff] %v404_v1  ;;  %79 = vst [vmem:[#allocation7 + $0x178] sm:$0xff] %v404_v1  ;;  %v295_v60 = vrot.slane %v279_v58, 4 }
  0x2e   :  { %80 = vst [vmem:[#allocation7 + $0x180] sm:$0xff] %v404_v1  ;;  %81 = vst [vmem:[#allocation7 + $0x188] sm:$0xff] %v404_v1 }
  0x2f   :  { %82 = vst [vmem:[#allocation7 + $0x190] sm:$0xff] %v404_v1  ;;  %83 = vst [vmem:[#allocation7 + $0x198] sm:$0xff] %v404_v1 }
  0x30   :  { %84 = vst [vmem:[#allocation7 + $0x1a0] sm:$0xff] %v404_v1  ;;  %85 = vst [vmem:[#allocation7 + $0x1a8] sm:$0xff] %v404_v1 }
  0x31   :  { %86 = vst [vmem:[#allocation7 + $0x1b0] sm:$0xff] %v404_v1  ;;  %87 = vst [vmem:[#allocation7 + $0x1b8] sm:$0xff] %v404_v1 }
  0x32   :  { %88 = vst [vmem:[#allocation7 + $0x1c0] sm:$0xff] %v404_v1  ;;  %89 = vst [vmem:[#allocation7 + $0x1c8] sm:$0xff] %v404_v1 }
  0x33   :  { %90 = vst [vmem:[#allocation7 + $0x1d0] sm:$0xff] %v404_v1  ;;  %91 = vst [vmem:[#allocation7 + $0x1d8] sm:$0xff] %v404_v1 }
  0x34   :  { %92 = vst [vmem:[#allocation7 + $0x1e0] sm:$0xff] %v404_v1  ;;  %93 = vst [vmem:[#allocation7 + $0x1e8] sm:$0xff] %v404_v1 }
  0x35   :  { %94 = vst [vmem:[#allocation7 + $0x1f0] sm:$0xff] %v404_v1  ;;  %95 = vst [vmem:[#allocation7 + $0x1f8] sm:$0xff] %v404_v1 }
  0x36   :  { %96 = vst [vmem:[#allocation7 + $0x200] sm:$0xff] %v404_v1  ;;  %97 = vst [vmem:[#allocation7 + $0x208] sm:$0xff] %v404_v1 }
  0x37   :  { %98 = vst [vmem:[#allocation7 + $0x210] sm:$0xff] %v404_v1  ;;  %99 = vst [vmem:[#allocation7 + $0x218] sm:$0xff] %v404_v1 }
  0x38   :  { %100 = vst [vmem:[#allocation7 + $0x220] sm:$0xff] %v404_v1  ;;  %101 = vst [vmem:[#allocation7 + $0x228] sm:$0xff] %v404_v1 }
  0x39   :  { %102 = vst [vmem:[#allocation7 + $0x230] sm:$0xff] %v404_v1  ;;  %103 = vst [vmem:[#allocation7 + $0x238] sm:$0xff] %v404_v1 }
  0x3a   :  { %104 = vst [vmem:[#allocation7 + $0x240] sm:$0xff] %v404_v1  ;;  %105 = vst [vmem:[#allocation7 + $0x248] sm:$0xff] %v404_v1 }
  0x3b   :  { %106 = vst [vmem:[#allocation7 + $0x250] sm:$0xff] %v404_v1  ;;  %107 = vst [vmem:[#allocation7 + $0x258] sm:$0xff] %v404_v1 }
  0x3c   :  { %108 = vst [vmem:[#allocation7 + $0x260] sm:$0xff] %v404_v1  ;;  %109 = vst [vmem:[#allocation7 + $0x268] sm:$0xff] %v404_v1 }
  0x3d   :  { %110 = vst [vmem:[#allocation7 + $0x270] sm:$0xff] %v404_v1  ;;  %111 = vst [vmem:[#allocation7 + $0x278] sm:$0xff] %v404_v1 }
  0x3e   :  { %112 = vst [vmem:[#allocation7 + $0x280] sm:$0xff] %v404_v1  ;;  %113 = vst [vmem:[#allocation7 + $0x288] sm:$0xff] %v404_v1 }
  0x3f   :  { %114 = vst [vmem:[#allocation7 + $0x290] sm:$0xff] %v404_v1  ;;  %115 = vst [vmem:[#allocation7 + $0x298] sm:$0xff] %v404_v1 }
  0x40   :  { %116 = vst [vmem:[#allocation7 + $0x2a0] sm:$0xff] %v404_v1  ;;  %117 = vst [vmem:[#allocation7 + $0x2a8] sm:$0xff] %v404_v1 }
  0x41   :  { %118 = vst [vmem:[#allocation7 + $0x2b0] sm:$0xff] %v404_v1  ;;  %119 = vst [vmem:[#allocation7 + $0x2b8] sm:$0xff] %v404_v1 }
  0x42   :  { %120 = vst [vmem:[#allocation7 + $0x2c0] sm:$0xff] %v404_v1  ;;  %121 = vst [vmem:[#allocation7 + $0x2c8] sm:$0xff] %v404_v1 }
  0x43   :  { %122 = vst [vmem:[#allocation7 + $0x2d0] sm:$0xff] %v404_v1  ;;  %123 = vst [vmem:[#allocation7 + $0x2d8] sm:$0xff] %v404_v1 }
  0x44   :  { %124 = vst [vmem:[#allocation7 + $0x2e0] sm:$0xff] %v404_v1  ;;  %125 = vst [vmem:[#allocation7 + $0x2e8] sm:$0xff] %v404_v1 }
  0x45   :  { %126 = vst [vmem:[#allocation7 + $0x2f0] sm:$0xff] %v404_v1  ;;  %127 = vst [vmem:[#allocation7 + $0x2f8] sm:$0xff] %v404_v1 }
  0x46   :  { %128 = vst [vmem:[#allocation7 + $0x300] sm:$0xff] %v404_v1  ;;  %129 = vst [vmem:[#allocation7 + $0x308] sm:$0xff] %v404_v1 }
  0x47   :  { %130 = vst [vmem:[#allocation7 + $0x310] sm:$0xff] %v404_v1  ;;  %131 = vst [vmem:[#allocation7 + $0x318] sm:$0xff] %v404_v1 }
  0x48   :  { %132 = vst [vmem:[#allocation7 + $0x320] sm:$0xff] %v404_v1  ;;  %133 = vst [vmem:[#allocation7 + $0x328] sm:$0xff] %v404_v1 }
  0x49   :  { %134 = vst [vmem:[#allocation7 + $0x330] sm:$0xff] %v404_v1  ;;  %135 = vst [vmem:[#allocation7 + $0x338] sm:$0xff] %v404_v1 }
  0x4a   :  { %136 = vst [vmem:[#allocation7 + $0x340] sm:$0xff] %v404_v1  ;;  %137 = vst [vmem:[#allocation7 + $0x348] sm:$0xff] %v404_v1 }
  0x4b   :  { %138 = vst [vmem:[#allocation7 + $0x350] sm:$0xff] %v404_v1  ;;  %139 = vst [vmem:[#allocation7 + $0x358] sm:$0xff] %v404_v1 }
  0x4c   :  { %140 = vst [vmem:[#allocation7 + $0x360] sm:$0xff] %v404_v1  ;;  %141 = vst [vmem:[#allocation7 + $0x368] sm:$0xff] %v404_v1 }
  0x4d   :  { %142 = vst [vmem:[#allocation7 + $0x370] sm:$0xff] %v404_v1  ;;  %143 = vst [vmem:[#allocation7 + $0x378] sm:$0xff] %v404_v1 }
  0x4e   :  { %144 = vst [vmem:[#allocation7 + $0x380] sm:$0xff] %v404_v1  ;;  %145 = vst [vmem:[#allocation7 + $0x388] sm:$0xff] %v404_v1 }
  0x4f   :  { %146 = vst [vmem:[#allocation7 + $0x390] sm:$0xff] %v404_v1  ;;  %147 = vst [vmem:[#allocation7 + $0x398] sm:$0xff] %v404_v1 }
  0x50   :  { %148 = vst [vmem:[#allocation7 + $0x3a0] sm:$0xff] %v404_v1  ;;  %149 = vst [vmem:[#allocation7 + $0x3a8] sm:$0xff] %v404_v1 }
  0x51   :  { %150 = vst [vmem:[#allocation7 + $0x3b0] sm:$0xff] %v404_v1  ;;  %151 = vst [vmem:[#allocation7 + $0x3b8] sm:$0xff] %v404_v1 }
  0x52   :  { %152 = vst [vmem:[#allocation7 + $0x3c0] sm:$0xff] %v404_v1  ;;  %153 = vst [vmem:[#allocation7 + $0x3c8] sm:$0xff] %v404_v1 }
  0x53   :  { %154 = vst [vmem:[#allocation7 + $0x3d0] sm:$0xff] %v404_v1  ;;  %155 = vst [vmem:[#allocation7 + $0x3d8] sm:$0xff] %v404_v1 }
  0x54   :  { %156 = vst [vmem:[#allocation7 + $0x3e0] sm:$0xff] %v404_v1  ;;  %158 = vst.msk [vmem:[#allocation7 + $0x3e8] sm:$0xff] %vm157_vm0, %v404_v1 }
  0x55   :  { %221 = vst [vmem:[#allocation7] sm:$0xf] %v213_v25  ;;  %222 = vst [vmem:[#allocation7 + $0x8] sm:$0xf] %v214_v26 }
  0x56   :  { %223 = vst [vmem:[#allocation7 + $0x10] sm:$0xf] %v215_v27  ;;  %224 = vst [vmem:[#allocation7 + $0x18] sm:$0xf] %v216_v29 }
  0x57   :  { %225 = vst [vmem:[#allocation7 + $0x20] sm:$0xf] %v217_v30  ;;  %226 = vst [vmem:[#allocation7 + $0x28] sm:$0xf] %v218_v33 }
  0x58   :  { %227 = vst [vmem:[#allocation7 + $0x30] sm:$0xf] %v219_v37  ;;  %228 = vst [vmem:[#allocation7 + $0x38] sm:$0xf] %v220_v41 }
  0x59   :  { %304 = vst [vmem:[#allocation7] sm:$0xf0] %v288_v49  ;;  %305 = vst [vmem:[#allocation7 + $0x8] sm:$0xf0] %v289_v50 }
  0x5a   :  { %306 = vst [vmem:[#allocation7 + $0x10] sm:$0xf0] %v290_v53  ;;  %307 = vst [vmem:[#allocation7 + $0x18] sm:$0xf0] %v291_v54 }
  0x5b   :  { %308 = vst [vmem:[#allocation7 + $0x20] sm:$0xf0] %v292_v55  ;;  %309 = vst [vmem:[#allocation7 + $0x28] sm:$0xf0] %v293_v57 }
  0x5c   :  { %310 = vst [vmem:[#allocation7 + $0x30] sm:$0xf0] %v294_v59  ;;  %311 = vst [vmem:[#allocation7 + $0x38] sm:$0xf0] %v295_v60 }
  0x5d   :  { %387 = shalt.err (!%p384_p0)
}
  0x5e   :  { %321 = dma.vmem_to_hbm [thread:$0]  %s319_s1, 16128, %s552_s2, [#allocation4]  }
  0x5f   :  { %400 = dma.done.wait [#allocation4], 16128  }
  0x60   :  { %401 = vsyncadd [#allocation4], 4294951168 }
  0x61   :  { %325 = vsyncpa [#allocation3], 1 }
  0x62   :  { %326 = vsyncpa [#allocation6], 1 }
  0x63   :  { %327 = vsyncpa [#allocation4], 1 }

</bundles_post_ra>
